<compile_context>
chip_gen: v7x
topology: tpu7x:2x2x1
jax: 0.10.0
libtpu: 0.0.40
codegen_flags: <defaults>
</compile_context>

<pallas_src>
import functools

import jax
import jax.numpy as jnp
from jax import lax
from jax.experimental import pallas as pl
from jax.experimental.pallas import tpu as pltpu


def _round_up(x, m):
    return ((x + m - 1) // m) * m


# -----------------------------------------------------------------------------
# Kernel 1: whole-K softmax (K/V for the current (b, h) resident in VMEM).
# -----------------------------------------------------------------------------
def _sdpa_whole_kernel(*refs, temperature, has_mask, kv_valid, return_attn,
                       mxu_dtype):
    idx = 0
    q_ref = refs[idx]; idx += 1
    k_ref = refs[idx]; idx += 1
    v_ref = refs[idx]; idx += 1
    mask_ref = None
    if has_mask:
        mask_ref = refs[idx]; idx += 1
    out_ref = refs[idx]; idx += 1
    attn_ref = refs[idx] if return_attn else None

    q = q_ref[0, 0]                      # (TQ, Dk)   native dtype
    k = k_ref[0, 0]                      # (Lk_p, Dk) native dtype
    v = v_ref[0, 0]                      # (Lk_p, Dv) native dtype

    q_scaled = q * (1.0 / temperature)   # weak-typed scalar keeps q's dtype
    if mxu_dtype is not None:
        q_scaled = q_scaled.astype(mxu_dtype)
        k = k.astype(mxu_dtype)

    # scores = (q / T) @ k^T  -- NT dot_general, f32 accumulation on the MXU.
    scores = lax.dot_general(
        q_scaled, k,
        dimension_numbers=(((1,), (1,)), ((), ())),
        preferred_element_type=jnp.float32)           # (TQ, Lk_p) f32

    neg = jnp.float32(-1.0e9)
    if has_mask:
        m = mask_ref[0, 0]                            # (TQ or 1, Lk_p) int8
        scores = jnp.where(m != 0, scores, neg)       # broadcasts over TQ if needed
    elif kv_valid is not None:
        # suppress zero-padded key columns without materializing any mask in HBM
        col = lax.broadcasted_iota(jnp.int32, scores.shape, 1)
        scores = jnp.where(col < kv_valid, scores, neg)

    # numerically stable softmax over the key axis (f32, exact division)
    s_max = jnp.max(scores, axis=-1, keepdims=True)
    unnorm = jnp.exp(scores - s_max)
    denom = jnp.sum(unnorm, axis=-1, keepdims=True)
    attn = unnorm / denom                             # (TQ, Lk_p) f32

    pv_dtype = v.dtype if mxu_dtype is None else mxu_dtype
    out = jnp.dot(attn.astype(pv_dtype), v.astype(pv_dtype),
                  preferred_element_type=jnp.float32)  # (TQ, Dv) f32

    out_ref[0, 0] = out.astype(out_ref.dtype)
    if return_attn:
        attn_ref[0, 0] = attn.astype(attn_ref.dtype)


# -----------------------------------------------------------------------------
# Kernel 2: streamed-K online softmax (extra Lk grid axis, m/l/acc VMEM scratch).
# Used when the attention matrix is not returned and Lk is long / VMEM is tight.
# -----------------------------------------------------------------------------
def _sdpa_flash_kernel(*refs, temperature, has_mask, kv_valid, block_k,
                       mxu_dtype):
    idx = 0
    q_ref = refs[idx]; idx += 1
    k_ref = refs[idx]; idx += 1
    v_ref = refs[idx]; idx += 1
    mask_ref = None
    if has_mask:
        mask_ref = refs[idx]; idx += 1
    out_ref = refs[idx]; idx += 1
    m_sc = refs[idx]; idx += 1
    l_sc = refs[idx]; idx += 1
    acc_sc = refs[idx]; idx += 1

    kv = pl.program_id(3)

    @pl.when(kv == 0)
    def _():
        m_sc[...] = jnp.full_like(m_sc, -jnp.inf)
        l_sc[...] = jnp.zeros_like(l_sc)
        acc_sc[...] = jnp.zeros_like(acc_sc)

    q = q_ref[0, 0]                      # (TQ, Dk)
    k = k_ref[0, 0]                      # (TK, Dk)
    v = v_ref[0, 0]                      # (TK, Dv)

    q_scaled = q * (1.0 / temperature)
    if mxu_dtype is not None:
        q_scaled = q_scaled.astype(mxu_dtype)
        k = k.astype(mxu_dtype)

    s = lax.dot_general(
        q_scaled, k,
        dimension_numbers=(((1,), (1,)), ((), ())),
        preferred_element_type=jnp.float32)           # (TQ, TK) f32

    neg = jnp.float32(-1.0e9)
    if has_mask:
        m = mask_ref[0, 0]                            # (TQ or 1, TK) int8
        s = jnp.where(m != 0, s, neg)
    elif kv_valid is not None:
        col = kv * block_k + lax.broadcasted_iota(jnp.int32, s.shape, 1)
        s = jnp.where(col < kv_valid, s, neg)

    m_prev = m_sc[...]
    m_new = jnp.maximum(m_prev, jnp.max(s, axis=-1, keepdims=True))
    alpha = jnp.exp(m_prev - m_new)
    p = jnp.exp(s - m_new)
    l_sc[...] = alpha * l_sc[...] + jnp.sum(p, axis=-1, keepdims=True)

    pv_dtype = v.dtype if mxu_dtype is None else mxu_dtype
    acc_sc[...] = alpha * acc_sc[...] + jnp.dot(
        p.astype(pv_dtype), v.astype(pv_dtype),
        preferred_element_type=jnp.float32)
    m_sc[...] = m_new

    @pl.when(kv == pl.num_programs(3) - 1)
    def _():
        out_ref[0, 0] = (acc_sc[...] / l_sc[...]).astype(out_ref.dtype)


# -----------------------------------------------------------------------------
# Wrapper
# -----------------------------------------------------------------------------
def _prep_mask(mask, Lq, Lk, Lq_p, Lk_p):
    """Canonicalize mask to 4-D int8, keeping batch/head/query dims minimal."""
    m = jnp.asarray(mask)
    while m.ndim < 4:
        m = m[None]
    m = (m != 0).astype(jnp.int8)
    if m.shape[3] != Lk:                 # rare: broadcast a size-1 key axis
        m = jnp.broadcast_to(m, m.shape[:3] + (Lk,))
    mask_q_is_one = (m.shape[2] == 1)    # key-padding style mask: keep 1 row
    pad_lq = 0 if mask_q_is_one else (Lq_p - Lq)
    pad_lk = Lk_p - Lk
    if pad_lq or pad_lk:
        m = jnp.pad(m, ((0, 0), (0, 0), (0, pad_lq), (0, pad_lk)))
    return m, mask_q_is_one


def scaled_dot_product_attention(q, k, v, mask=None, *, temperature,
                                 return_attn=True, attn_dtype=None,
                                 bf16_matmul=False, block_q=None, block_k=None):
    """q:[B,H,Lq,Dk], k:[B,H,Lk,Dk], v:[B,H,Lk,Dv]; mask broadcastable to [B,H,Lq,Lk].

    bf16_matmul: when inputs are f32, run the two MXU matmuls with bf16 operands
        (f32 accumulation). Off by default to keep exact f32 semantics.
    block_k: if given (and return_attn=False) forces the streamed-K online-softmax path.
    """
    B, H, Lq, Dk = q.shape
    Lk = k.shape[2]
    Dv = v.shape[3]

    if attn_dtype is None:
        attn_dtype = q.dtype
    mxu_dtype = jnp.bfloat16 if (bf16_matmul and q.dtype == jnp.float32) else None

    # ---- per-generation VMEM budget: ~3/4 of physical, capped at 96 MiB ----
    try:
        vmem_cap = int(pltpu.get_tpu_info().vmem_capacity_bytes)
    except Exception:
        vmem_cap = 64 << 20                     # conservative fallback (v7x-sized)
    vmem_limit = max(32 << 20, min((vmem_cap * 3) // 4, 96 << 20))

    itemsize = jnp.dtype(q.dtype).itemsize
    has_mask = mask is not None

    def whole_vmem_estimate(tq, lk_p):
        blk = tq * Dk + lk_p * (Dk + Dv) + tq * Dv
        per = 2 * blk * itemsize                               # double-buffered blocks
        if return_attn:
            per += 2 * tq * lk_p * jnp.dtype(attn_dtype).itemsize
        if has_mask:
            per += 2 * tq * lk_p                               # int8 mask block
        per += 4 * tq * lk_p * 4                               # f32 softmax temporaries
        return per

    # ---- q tile ----
    if block_q is not None:
        TQ = min(_round_up(block_q, 8), _round_up(Lq, 8))
    else:
        TQ = 128 if Lq >= 128 else _round_up(Lq, 8)

    # ---- whole-K vs streamed-K (online softmax) ----
    use_flash = (not return_attn) and (
        block_k is not None
        or Lk >= 1024
        or whole_vmem_estimate(TQ, Lk) > (vmem_limit * 3) // 4)

    if use_flash:
        TK = 512 if block_k is None else block_k
        TK = min(_round_up(TK, 128), _round_up(Lk, 128))
        Lk_p = _round_up(Lk, TK)
    else:
        # pad keys only when the attn matrix is written back (lane-dense attn stores);
        # otherwise keep Lk native (block dim == full array dim is legal).
        Lk_p = _round_up(Lk, 128) if (return_attn and Lk % 128 != 0) else Lk
        TK = Lk_p
        # bigger q tile when there is plenty of VMEM headroom (v6e-style sweep)
        if (block_q is None and Lq >= 256
                and whole_vmem_estimate(256, Lk_p) <= vmem_limit // 2):
            TQ = 256

    Lq_p = _round_up(Lq, TQ)

    # ---- pad operands only where actually needed (Dk / Dv stay native) ----
    qp = q if Lq_p == Lq else jnp.pad(q, ((0, 0), (0, 0), (0, Lq_p - Lq), (0, 0)))
    kp = k if Lk_p == Lk else jnp.pad(k, ((0, 0), (0, 0), (0, Lk_p - Lk), (0, 0)))
    vp = v if Lk_p == Lk else jnp.pad(v, ((0, 0), (0, 0), (0, Lk_p - Lk), (0, 0)))
    inputs = [qp, kp, vp]

    Bm = Hm = 1
    mask_q_is_one = False
    if has_mask:
        m4, mask_q_is_one = _prep_mask(mask, Lq, Lk, Lq_p, Lk_p)
        Bm, Hm = int(m4.shape[0]), int(m4.shape[1])
        inputs.append(m4)
    # padded key columns need in-kernel suppression only when no user mask exists
    kv_valid = Lk if (Lk_p > Lk and not has_mask) else None

    compiler_params = pltpu.CompilerParams(
        dimension_semantics=(("parallel",) * 3
                             + (("arbitrary",) if use_flash else ())),
        vmem_limit_bytes=int(vmem_limit))

    if not use_flash:
        grid = (B, H, Lq_p // TQ)
        in_specs = [
            pl.BlockSpec((1, 1, TQ, Dk), lambda b, h, i: (b, h, i, 0)),
            pl.BlockSpec((1, 1, Lk_p, Dk), lambda b, h, i: (b, h, 0, 0)),
            pl.BlockSpec((1, 1, Lk_p, Dv), lambda b, h, i: (b, h, 0, 0)),
        ]
        if has_mask:
            mq_blk = 1 if mask_q_is_one else TQ

            def mask_map(b, h, i, _Bm=Bm, _Hm=Hm, _one=mask_q_is_one):
                return (b if _Bm > 1 else 0, h if _Hm > 1 else 0,
                        0 if _one else i, 0)

            in_specs.append(pl.BlockSpec((1, 1, mq_blk, Lk_p), mask_map))

        out_shapes = [jax.ShapeDtypeStruct((B, H, Lq_p, Dv), q.dtype)]
        out_specs = [pl.BlockSpec((1, 1, TQ, Dv), lambda b, h, i: (b, h, i, 0))]
        if return_attn:
            out_shapes.append(jax.ShapeDtypeStruct((B, H, Lq_p, Lk_p), attn_dtype))
            out_specs.append(
                pl.BlockSpec((1, 1, TQ, Lk_p), lambda b, h, i: (b, h, i, 0)))

        kernel = functools.partial(
            _sdpa_whole_kernel, temperature=float(temperature),
            has_mask=has_mask, kv_valid=kv_valid, return_attn=return_attn,
            mxu_dtype=mxu_dtype)

        results = pl.pallas_call(
            kernel,
            out_shape=tuple(out_shapes),
            grid_spec=pltpu.PrefetchScalarGridSpec(
                num_scalar_prefetch=0, grid=grid,
                in_specs=in_specs, out_specs=out_specs),
            compiler_params=compiler_params,
        )(*inputs)

        out = results[0][:, :, :Lq, :Dv]
        if return_attn:
            return out, results[1][:, :, :Lq, :Lk]
        return out

    # ---- streamed-K path (return_attn is necessarily False here) ----
    grid = (B, H, Lq_p // TQ, Lk_p // TK)
    in_specs = [
        pl.BlockSpec((1, 1, TQ, Dk), lambda b, h, i, kv: (b, h, i, 0)),
        pl.BlockSpec((1, 1, TK, Dk), lambda b, h, i, kv: (b, h, kv, 0)),
        pl.BlockSpec((1, 1, TK, Dv), lambda b, h, i, kv: (b, h, kv, 0)),
    ]
    if has_mask:
        mq_blk = 1 if mask_q_is_one else TQ

        def mask_map(b, h, i, kv, _Bm=Bm, _Hm=Hm, _one=mask_q_is_one):
            return (b if _Bm > 1 else 0, h if _Hm > 1 else 0,
                    0 if _one else i, kv)

        in_specs.append(pl.BlockSpec((1, 1, mq_blk, TK), mask_map))

    kernel = functools.partial(
        _sdpa_flash_kernel, temperature=float(temperature),
        has_mask=has_mask, kv_valid=kv_valid, block_k=TK, mxu_dtype=mxu_dtype)

    out = pl.pallas_call(
        kernel,
        out_shape=jax.ShapeDtypeStruct((B, H, Lq_p, Dv), q.dtype),
        grid_spec=pltpu.PrefetchScalarGridSpec(
            num_scalar_prefetch=0, grid=grid,
            in_specs=in_specs,
            out_specs=pl.BlockSpec((1, 1, TQ, Dv), lambda b, h, i, kv: (b, h, i, 0)),
            scratch_shapes=[pltpu.VMEM((TQ, 1), jnp.float32),
                            pltpu.VMEM((TQ, 1), jnp.float32),
                            pltpu.VMEM((TQ, Dv), jnp.float32)]),
        compiler_params=compiler_params,
    )(*inputs)

    return out[:, :, :Lq, :Dv]


# -----------------------------------------------------------------------------
# Reference + self-test
# -----------------------------------------------------------------------------
def _reference(q, k, v, mask, temperature):
    scores = jnp.einsum("bhqd,bhkd->bhqk", q / temperature, k)
    if mask is not None:
        scores = jnp.where(mask == 0, -1.0e9, scores)
    attn = jax.nn.softmax(scores, axis=-1)
    out = jnp.einsum("bhqk,bhkd->bhqd", attn, v)
    return out, attn


if __name__ == "__main__":
    key = jax.random.PRNGKey(0)
    Dk = Dv = 32
    temperature = float(Dk) ** 0.5
    TOL = dict(atol=1e-3, rtol=1e-3)

    # --- case 1: full [B,1,Lq,Lk] mask, attn returned (whole-K path, Lk padded to 128)
    B, H, Lq, Lk = 2, 2, 8, 8
    kq, kk, kv_, km = jax.random.split(key, 4)
    q = jax.random.normal(kq, (B, H, Lq, Dk), dtype=jnp.float32)
    k = jax.random.normal(kk, (B, H, Lk, Dk), dtype=jnp.float32)
    v = jax.random.normal(kv_, (B, H, Lk, Dv), dtype=jnp.float32)
    mask = (jax.random.uniform(km, (B, 1, Lq, Lk)) > 0.2).astype(jnp.int32)

    out, attn = scaled_dot_product_attention(q, k, v, mask, temperature=temperature)
    out = jax.block_until_ready(out); attn = jax.block_until_ready(attn)
    ref_out, ref_attn = _reference(q, k, v, mask, temperature)
    assert jnp.allclose(out, ref_out, **TOL), "output mismatch (full mask)"
    assert jnp.allclose(attn, ref_attn, **TOL), "attn mismatch (full mask)"

    # --- case 2: key-padding mask [B,1,1,Lk] (kept 1-row in HBM, broadcast in-kernel)
    lens = jnp.array([6, 8])
    kp_mask = (jnp.arange(Lk)[None, None, None, :]
               < lens[:, None, None, None]).astype(jnp.int32)
    out2, attn2 = scaled_dot_product_attention(q, k, v, kp_mask, temperature=temperature)
    out2 = jax.block_until_ready(out2)
    ref_out2, ref_attn2 = _reference(q, k, v, kp_mask, temperature)
    assert jnp.allclose(out2, ref_out2, **TOL), "output mismatch (key-pad mask)"
    assert jnp.allclose(attn2, ref_attn2, **TOL), "attn mismatch (key-pad mask)"

    # --- case 3: no mask, output only (no attn writeback, no Lk padding, no mask stream)
    out3 = scaled_dot_product_attention(q, k, v, None, temperature=temperature,
                                        return_attn=False)
    out3 = jax.block_until_ready(out3)
    ref_out3, _ = _reference(q, k, v, None, temperature)
    assert jnp.allclose(out3, ref_out3, **TOL), "output mismatch (unmasked)"

    # --- case 4: streamed-K (online softmax) path with a key-padding mask
    B4, H4, Lq4, Lk4 = 2, 2, 16, 256
    k4q, k4k, k4v = jax.random.split(jax.random.PRNGKey(1), 3)
    q4 = jax.random.normal(k4q, (B4, H4, Lq4, Dk), dtype=jnp.float32)
    k4 = jax.random.normal(k4k, (B4, H4, Lk4, Dk), dtype=jnp.float32)
    v4 = jax.random.normal(k4v, (B4, H4, Lk4, Dv), dtype=jnp.float32)
    lens4 = jnp.array([200, 256])
    kp4 = (jnp.arange(Lk4)[None, None, None, :]
           < lens4[:, None, None, None]).astype(jnp.int32)
    out4 = scaled_dot_product_attention(q4, k4, v4, kp4, temperature=temperature,
                                        return_attn=False, block_k=128)
    out4 = jax.block_until_ready(out4)
    ref_out4, _ = _reference(q4, k4, v4, kp4, temperature)
    assert jnp.allclose(out4, ref_out4, **TOL), "output mismatch (streamed-K)"

    # --- case 5: bf16 MXU operands on f32 inputs (flash-attention-standard numerics)
    out5, attn5 = scaled_dot_product_attention(q, k, v, mask, temperature=temperature,
                                               bf16_matmul=True)
    out5 = jax.block_until_ready(out5)
    assert jnp.allclose(out5, ref_out, atol=3e-2, rtol=3e-2), "output mismatch (bf16 MXU)"
    assert jnp.allclose(attn5, ref_attn, atol=3e-2, rtol=3e-2), "attn mismatch (bf16 MXU)"

    print("KERNEL_OK")
</pallas_src>

<mosaic_0001>
module attributes {stable_mosaic.version = 11 : i64} {
  func.func @_sdpa_whole_kernel(%arg0: i32, %arg1: i32, %arg2: i32, %arg3: memref<1x1x8x32xf32, #tpu.memory_space<vmem>>, %arg4: memref<1x1x128x32xf32, #tpu.memory_space<vmem>>, %arg5: memref<1x1x128x32xf32, #tpu.memory_space<vmem>>, %arg6: memref<1x1x8x128xi8, #tpu.memory_space<vmem>>, %arg7: memref<1x1x8x32xf32, #tpu.memory_space<vmem>>, %arg8: memref<1x1x8x128xf32, #tpu.memory_space<vmem>>) attributes {dimension_semantics = [#tpu.dimension_semantics<parallel>, #tpu.dimension_semantics<parallel>, #tpu.dimension_semantics<parallel>], iteration_bounds = array<i64: 2, 2, 1>, scalar_prefetch = 0 : i64, scratch_operands = 0 : i64, tpu.core_type = #tpu.core_type<tc>, window_params = [{transform_indices = @transform_0, window_bounds = array<i64: 1, 1, 8, 32>}, {transform_indices = @transform_1, window_bounds = array<i64: 1, 1, 128, 32>}, {transform_indices = @transform_2, window_bounds = array<i64: 1, 1, 128, 32>}, {transform_indices = @transform_3, window_bounds = array<i64: 1, 1, 8, 128>}, {transform_indices = @transform_4, window_bounds = array<i64: 1, 1, 8, 32>}, {transform_indices = @transform_5, window_bounds = array<i64: 1, 1, 8, 128>}]} {
    %c0 = arith.constant 0 : index
    %c0_0 = arith.constant 0 : index
    %c0_1 = arith.constant 0 : index
    %c0_2 = arith.constant 0 : index
    %0 = vector.load %arg3[%c0, %c0_0, %c0_1, %c0_2] : memref<1x1x8x32xf32, #tpu.memory_space<vmem>>, vector<1x1x8x32xf32>
    %1 = vector.shape_cast %0 : vector<1x1x8x32xf32> to vector<8x32xf32>
    %c0_3 = arith.constant 0 : index
    %c0_4 = arith.constant 0 : index
    %c0_5 = arith.constant 0 : index
    %c0_6 = arith.constant 0 : index
    %2 = vector.load %arg4[%c0_3, %c0_4, %c0_5, %c0_6] : memref<1x1x128x32xf32, #tpu.memory_space<vmem>>, vector<1x1x128x32xf32>
    %3 = vector.shape_cast %2 : vector<1x1x128x32xf32> to vector<128x32xf32>
    %c0_7 = arith.constant 0 : index
    %c0_8 = arith.constant 0 : index
    %c0_9 = arith.constant 0 : index
    %c0_10 = arith.constant 0 : index
    %4 = vector.load %arg5[%c0_7, %c0_8, %c0_9, %c0_10] : memref<1x1x128x32xf32, #tpu.memory_space<vmem>>, vector<1x1x128x32xf32>
    %5 = vector.shape_cast %4 : vector<1x1x128x32xf32> to vector<128x32xf32>
    %cst = arith.constant 0.176776692 : f32
    %6 = vector.broadcast %cst : f32 to vector<8x32xf32>
    %7 = arith.mulf %1, %6 : vector<8x32xf32>
    %cst_11 = arith.constant dense<0.000000e+00> : vector<8x128xf32>
    %8 = tpu.matmul %7, %3, %cst_11 {dimension_numbers = #tpu.dot_dimension_numbers<[1], [1], [0], [0], [0, 0, 1, 0], [], []>} : vector<8x32xf32>, vector<128x32xf32>, vector<8x128xf32> -> vector<8x128xf32>
    %c0_12 = arith.constant 0 : index
    %c0_13 = arith.constant 0 : index
    %c0_14 = arith.constant 0 : index
    %c0_15 = arith.constant 0 : index
    %9 = vector.load %arg6[%c0_12, %c0_13, %c0_14, %c0_15] : memref<1x1x8x128xi8, #tpu.memory_space<vmem>>, vector<1x1x8x128xi8>
    %10 = vector.shape_cast %9 : vector<1x1x8x128xi8> to vector<8x128xi8>
    %c0_i8 = arith.constant 0 : i8
    %11 = vector.broadcast %c0_i8 : i8 to vector<8x128xi8>
    %12 = arith.cmpi ne, %10, %11 : vector<8x128xi8>
    %cst_16 = arith.constant -1.000000e+09 : f32
    %13 = vector.broadcast %cst_16 : f32 to vector<8x128xf32>
    %14 = arith.select %12, %8, %13 : vector<8x128xi1>, vector<8x128xf32>
    %cst_17 = arith.constant dense<0xFF800000> : vector<8xf32>
    %15 = vector.multi_reduction <maximumf>, %14, %cst_17 [1] : vector<8x128xf32> to vector<8xf32>
    %16 = vector.shape_cast %15 : vector<8xf32> to vector<8x1xf32>
    %17 = vector.broadcast %16 : vector<8x1xf32> to vector<8x128xf32>
    %18 = arith.subf %14, %17 : vector<8x128xf32>
    %19 = math.exp %18 : vector<8x128xf32>
    %cst_18 = arith.constant dense<0.000000e+00> : vector<8xf32>
    %20 = vector.multi_reduction <add>, %19, %cst_18 [1] : vector<8x128xf32> to vector<8xf32>
    %21 = vector.shape_cast %20 : vector<8xf32> to vector<8x1xf32>
    %22 = vector.broadcast %21 : vector<8x1xf32> to vector<8x128xf32>
    %23 = arith.divf %19, %22 : vector<8x128xf32>
    %cst_19 = arith.constant dense<0.000000e+00> : vector<8x32xf32>
    %24 = tpu.matmul %23, %5, %cst_19 {dimension_numbers = #tpu.dot_dimension_numbers<[1], [0], [0], [1], [0, 0, 1, 1], [], []>} : vector<8x128xf32>, vector<128x32xf32>, vector<8x32xf32> -> vector<8x32xf32>
    %c0_20 = arith.constant 0 : index
    %c0_21 = arith.constant 0 : index
    %c0_22 = arith.constant 0 : index
    %c0_23 = arith.constant 0 : index
    %25 = vector.load %arg7[%c0_20, %c0_21, %c0_22, %c0_23] : memref<1x1x8x32xf32, #tpu.memory_space<vmem>>, vector<1x1x8x32xf32>
    %26 = vector.shape_cast %25 : vector<1x1x8x32xf32> to vector<8x32xf32>
    %27 = vector.shape_cast %24 : vector<8x32xf32> to vector<1x1x8x32xf32>
    tpu.vector_store %arg7[%c0_20, %c0_21, %c0_22, %c0_23], %27 {strides = array<i32>} : memref<1x1x8x32xf32, #tpu.memory_space<vmem>>, vector<1x1x8x32xf32>,
    %c0_24 = arith.constant 0 : index
    %c0_25 = arith.constant 0 : index
    %c0_26 = arith.constant 0 : index
    %c0_27 = arith.constant 0 : index
    %28 = vector.load %arg8[%c0_24, %c0_25, %c0_26, %c0_27] : memref<1x1x8x128xf32, #tpu.memory_space<vmem>>, vector<1x1x8x128xf32>
    %29 = vector.shape_cast %28 : vector<1x1x8x128xf32> to vector<8x128xf32>
    %30 = vector.shape_cast %23 : vector<8x128xf32> to vector<1x1x8x128xf32>
    tpu.vector_store %arg8[%c0_24, %c0_25, %c0_26, %c0_27], %30 {strides = array<i32>} : memref<1x1x8x128xf32, #tpu.memory_space<vmem>>, vector<1x1x8x128xf32>,
    return
  }
  func.func @transform_0(%arg0: i32, %arg1: i32, %arg2: i32) -> (i32, i32, i32, i32) {
    %c0_i32 = arith.constant 0 : i32
    %c0_i32_0 = arith.constant 0 : i32
    return %arg0, %arg1, %arg2, %c0_i32 : i32, i32, i32, i32
  }
  func.func @transform_1(%arg0: i32, %arg1: i32, %arg2: i32) -> (i32, i32, i32, i32) {
    %c0_i32 = arith.constant 0 : i32
    %c0_i32_0 = arith.constant 0 : i32
    %c0_i32_1 = arith.constant 0 : i32
    return %arg0, %arg1, %c0_i32, %c0_i32_0 : i32, i32, i32, i32
  }
  func.func @transform_2(%arg0: i32, %arg1: i32, %arg2: i32) -> (i32, i32, i32, i32) {
    %c0_i32 = arith.constant 0 : i32
    %c0_i32_0 = arith.constant 0 : i32
    %c0_i32_1 = arith.constant 0 : i32
    return %arg0, %arg1, %c0_i32, %c0_i32_0 : i32, i32, i32, i32
  }
  func.func @transform_3(%arg0: i32, %arg1: i32, %arg2: i32) -> (i32, i32, i32, i32) {
    %c0_i32 = arith.constant 0 : i32
    %c0_i32_0 = arith.constant 0 : i32
    %c0_i32_1 = arith.constant 0 : i32
    return %arg0, %c0_i32, %arg2, %c0_i32_0 : i32, i32, i32, i32
  }
  func.func @transform_4(%arg0: i32, %arg1: i32, %arg2: i32) -> (i32, i32, i32, i32) {
    %c0_i32 = arith.constant 0 : i32
    %c0_i32_0 = arith.constant 0 : i32
    return %arg0, %arg1, %arg2, %c0_i32 : i32, i32, i32, i32
  }
  func.func @transform_5(%arg0: i32, %arg1: i32, %arg2: i32) -> (i32, i32, i32, i32) {
    %c0_i32 = arith.constant 0 : i32
    %c0_i32_0 = arith.constant 0 : i32
    return %arg0, %arg1, %arg2, %c0_i32 : i32, i32, i32, i32
  }
}

</mosaic_0001>

<bundles_post_ra>
// kernel: tpu_custom_call.1
= control target key start
LH: loop header
LB: loop body
LE: loop exit
PB: predicated region body
PF: predicated region fallthrough
CT: control target
= control target key end

     0   :  { %11 = vsyncpa [#allocation3], 0  ;;  %s1563_s0 = inlined_call_operand.vmem [shape: f32[2,2,8,32], index: 0, kind: input, shape index: {}]   ;;  %s1564_s1 = inlined_call_operand.vmem [shape: f32[2,2,128,32], index: 1, kind: input, shape index: {}]   ;;  %s1565_s2 = inlined_call_operand.vmem [shape: f32[2,2,128,32], index: 2, kind: input, shape index: {}]   ;;  %s1566_s3 = inlined_call_operand.vmem [shape: s8[2,1,8,128], index: 3, kind: input, shape index: {}]   ;;  %s1567_s4 = inlined_call_operand.hbm [shape: f32[2,2,8,32], index: 4, kind: output, shape index: {0}]   ;;  %s1568_s5 = inlined_call_operand.hbm [shape: f32[2,2,8,128], index: 5, kind: output, shape index: {1}]  }
   0x1   :  { %13 = vsyncpa [#allocation3 + $0x1], 0 }
   0x2   :  { %14 = vsyncpa [#allocation5], 0 }
   0x3   :  { %16 = vsyncpa [#allocation5 + $0x1], 0  ;;  %s1288_s18 = smov 0   ;;  %s1290_s19 = smov 0  }
   0x4   :  { %s1292_s20 = smov 0   ;;  %s1294_s21 = smov 0  }
   0x5   :  { %s1296_s22 = smov 0   ;;  %s1298_s23 = smov 0  }
   0x6   :  { %s1300_s24 = smov 0   ;;  %s1302_s25 = smov 0  }
   0x7 LB: > { %s839_s26 = sadd.s32 4294967295, %s1250_s25   ;;  %s840_s27 = sadd.s32 4294967294, %s1250_s25   ;;  %s1250_s25 = sphi %s1302_s25, %s22_s25   ;;  %s1246_s24 = sphi %s1300_s24, %s1581_s24   ;;  %s1242_s23 = sphi %s1298_s23, %s1580_s23   ;;  %s1238_s22 = sphi %s1296_s22, %s1579_s22   ;;  %s1234_s21 = sphi %s1294_s21, %s1578_s21   ;;  %s1230_s20 = sphi %s1292_s20, %s1577_s20   ;;  %s1226_s19 = sphi %s1290_s19, %s1576_s19   ;;  %s1222_s18 = sphi %s1288_s18, %s1575_s18  }
   0x8   : > { %s37_s28 = sadd.s32 1, %s1242_s23  ;;  %s41_s29 = sadd.s32 1, %s1246_s24 }
   0x9   : > { %p39_p0 = scmp.ge.s32.totalorder %s37_s28, 2  ;;  %p176_p1 = scmp.ne.s32.totalorder %s1230_s20, %s1226_s19 }
   0xa   : > { %p177_p2 = scmp.eq.s32.totalorder %s839_s26, 3  ;;  %p182_p5 = scmp.ne.s32.totalorder %s1226_s19, %s1222_s18 }
   0xb   : > { %s1583_s28 = smov (%p39_p0, %s37_s28), 0  ;;  %s1585_s29 = smov (!%p39_p0, %s41_s29), %s1246_s24 }
   0xc   : > { %s160_s30 = ssub.s32 %s1242_s23, %s1583_s28  ;;  %p1339_p3 = por %p177_p2, %p176_p1 }
   0xd   : > { %p43_p4 = scmp.ge.s32.totalorder %s1585_s29, 2  ;;  %p183_p6 = scmp.eq.s32.totalorder %s840_s27, 3 }
   0xe   : > { %p843_p7 = scmp.ge.s32.totalorder %s1250_s25, 1  ;;  %p279_p9 = scmp.lt.s32.totalorder %s1250_s25, 5 }
   0xf   : > { %s1587_s29 = smov (%p43_p4, %s1585_s29), 0  ;;  %p1348_p8 = por %p183_p6, %p182_p5 }
  0x10   : > { %s159_s8 = ssub.s32 %s1246_s24, %s1587_s29  ;;  %s166_s9 = sadd.s32 1, %s1230_s20 }
  0x11   : > { %s161_s10 = sor.u32 %s160_s30, %s159_s8  ;;  %p280_p10 = pnand %p843_p7, %p279_p9 }
  0x12   : > { %p164_p11 = scmp.eq.s32.totalorder %s161_s10, 0  ;;  %p343_p12 = scmp.lt.s32.totalorder (!%p280_p10), %s1238_s22, 1  ;;  %v1252_v0 = vmov (!%p280_p10), 0.0|0.0   ;;  %vm1253_vm0 = vmmov (!%p280_p10), 0   ;;  %v1254_v1 = vmov (!%p280_p10), 0.0   ;;  %vm415_vm1 = vcmask (!%p280_p10), 261120  }
  0x13   : > { %283 = sbr.rel (%p280_p10) target bundleno = 850 (0x352), region = 36  ;;  %p345_p13 = scmp.lt.s32.totalorder (!%p280_p10), %s1234_s21, 1  ;;  %984 = vmatprep.subr.bf16.mxu0 (!%p280_p10), %v1252_v0  ;;  %946 = vmatprep.mubr.msk.f32.mxu0 (!%p280_p10), %vm1253_vm0, %v1254_v1  ;;  %vm1385_vm2 = vmpackc.low (!%p280_p10), %vm415_vm1, %vm415_vm1  ;;  %v1255_v30 = vmov (!%p280_p10), 0  }
  0x14   : > { %s1357_s11 = scalar_select %p164_p11, %s1230_s20, %s166_s9  }
  0x15   : > { %1016 = vmatprep.subr.bf16.mxu1 (!%p280_p10), %v1252_v0  ;;  %981 = vmatprep.mubr.msk.f32.mxu1 (!%p280_p10), %vm1253_vm0, %v1254_v1 }
  0x1a   : > { %s1363_s12 = scalar_select %p343_p12, %s1238_s22, 1 }
  0x1b   : > { %s1367_s13 = scalar_select %p345_p13, %s1234_s21, 1 }
  0x1c   : > { %s849_s14 = sshll.u32 %s1363_s12, 5  ;;  %s846_s8 = sshll.u32 %s1363_s12, 1 }
  0x1d   : > { %s848_s15 = sshll.u32 %s1367_s13, 4  ;;  %s351_s9 = sadd.s32 %s846_s8, %s1367_s13 }
  0x1e   : > { %s1371_s16 = sadd.s32 %s849_s14, %s848_s15  ;;  %s847_s10 = sshll.u32 %s351_s9, 3 }
  0x1f   : > { %s850_s17 = sshll.u32 %s1371_s16, 3  ;;  %s353_s26 = scalar_lea.vmem %s1563_s0, %s847_s10 }
  0x20   : > { %s1379_s30 = scalar_lea.vmem %s1564_s1, %s850_s17  ;;  %v381_v27 = vld [vmem:[%s353_s26] sm:$0xff]  ;;  %s378_s27 = scalar_lea.vmem %s1566_s3, %s846_s8 }
  0x21   : > { %v382_v2 = vld [vmem:[%s1379_s30] sm:$0xff]  ;;  %v383_v3 = vld [vmem:[%s1379_s30 + $0x8] sm:$0xff]  ;;  %v384_v6 = vld [vmem:[%s1379_s30 + $0x10] sm:$0xff]  ;;  %v414_v28 = vmul.f32 0.17677669, %v381_v27  ;;  %s1440_s10 = scalar_lea.vmem %s1565_s2, %s850_s17  ;;  %s1466_s16 = sand.u32 1, %s1226_s19  }
  0x22   : > { %v985_v5 = vpack.c.bf16 %v383_v3, %v382_v2  ;;  %v385_v7 = vld [vmem:[%s1379_s30 + $0x18] sm:$0xff]  ;;  %v386_v9 = vld [vmem:[%s1379_s30 + $0x20] sm:$0xff]  ;;  %v387_v10 = vld [vmem:[%s1379_s30 + $0x28] sm:$0xff]  ;;  %s844_s17 = sshll.u32 %s1466_s16, 3  ;;  %s874_s14 = sshll.u32 %s1238_s22, 1 }
  0x23   : > { %v989_v8 = vpack.c.bf16 %v385_v7, %v384_v6  ;;  %v993_v11 = vpack.c.bf16 %v387_v10, %v386_v9  ;;  %v388_v12 = vld [vmem:[%s1379_s30 + $0x30] sm:$0xff]  ;;  %v389_v13 = vld [vmem:[%s1379_s30 + $0x38] sm:$0xff]  ;;  %v390_v15 = vld [vmem:[%s1379_s30 + $0x40] sm:$0xff]  ;;  %s342_s8 = scalar_lea.vmem [#allocation4], %s844_s17  ;;  %s1473_s15 = sadd.s32 %s1234_s21, %s874_s14 }
  0x24   : > { %987 = vmatpush3.bf16.xpose.msk.msra.mxu0 %vm1385_vm2, %v985_v5  ;;  %v997_v14 = vpack.c.bf16 %v389_v13, %v388_v12  ;;  %v391_v16 = vld [vmem:[%s1379_s30 + $0x48] sm:$0xff]  ;;  %v392_v18 = vld [vmem:[%s1379_s30 + $0x50] sm:$0xff]  ;;  %v393_v19 = vld [vmem:[%s1379_s30 + $0x58] sm:$0xff]  ;;  %s1569_s26 = sshll.u32 %s1473_s15, 7  ;;  %s630_s9 = scalar_lea.sflag [#allocation5], %s1466_s16 }
  0x25   : > { %988 = vmatprep.subr.bf16.mxu0 %v1252_v0  ;;  %v1001_v17 = vpack.c.bf16 %v391_v16, %v390_v15  ;;  %v1005_v20 = vpack.c.bf16 %v393_v19, %v392_v18  ;;  %v394_v21 = vld [vmem:[%s1379_s30 + $0x60] sm:$0xff]  ;;  %v395_v22 = vld [vmem:[%s1379_s30 + $0x68] sm:$0xff]  ;;  %v396_v24 = vld [vmem:[%s1379_s30 + $0x70] sm:$0xff]  ;;  %s1256_s22 = smov [#allocation4]  }
  0x26   : > { %v1009_v23 = vpack.c.bf16 %v395_v22, %v394_v21  ;;  %v397_v25 = vld [vmem:[%s1379_s30 + $0x78] sm:$0xff]  ;;  %v537_v29 = vld [vmem:[%s378_s27] sm:$0x3]  ;;  %v399_v37 = vld [vmem:[%s1440_s10 + $0x8] sm:$0xff]  ;;  %s1481_s27 = scalar_lea.hbm %s1568_s5, %s1569_s26  ;;  %s662_s30 = sshll.u32 %s342_s8, 4  ;;  %s663_s30 = int_to_ptr.vmem [resolvable:$true] %s662_s30 }
  0x27   : > { %v1013_v26 = vpack.c.bf16 %v397_v25, %v396_v24  ;;  %vm538_vm3 = vnez %v537_v29  ;;  %v398_v36 = vld [vmem:[%s1440_s10] sm:$0xff]  ;;  %v400_v38 = vld [vmem:[%s1440_s10 + $0x10] sm:$0xff]  ;;  %v401_v40 = vld [vmem:[%s1440_s10 + $0x18] sm:$0xff]  ;;  %s1128_s21 = sshll.u32 %s1256_s22, 4  ;;  %s1129_s21 = int_to_ptr.vmem [resolvable:$false] %s1128_s21 }
  0x28   : > { %v539_v31 = vsel %vm538_vm3, 16843009, %v1255_v30  ;;  %v1017_v39 = vpack.c.bf16 %v399_v37, %v398_v36  ;;  %v1020_v41 = vpack.c.bf16 %v401_v40, %v400_v38  ;;  %v402_v42 = vld [vmem:[%s1440_s10 + $0x20] sm:$0xff]  ;;  %v403_v43 = vld [vmem:[%s1440_s10 + $0x28] sm:$0xff]  ;;  %v404_v45 = vld [vmem:[%s1440_s10 + $0x30] sm:$0xff]  ;;  %s1130_s14 = scalar_lea.vmem %s1129_s21, 256  ;;  %p1131_p4 = scmp.lt.s32.totalorder %s663_s30, %s1129_s21 }
  0x29   : > { %v540_v32 = vunpack.c.0.s8 %v539_v31  ;;  %v1023_v44 = vpack.c.bf16 %v403_v43, %v402_v42  ;;  %v405_v46 = vld [vmem:[%s1440_s10 + $0x38] sm:$0xff]  ;;  %v406_v48 = vld [vmem:[%s1440_s10 + $0x40] sm:$0xff]  ;;  %v407_v49 = vld [vmem:[%s1440_s10 + $0x48] sm:$0xff] }
  0x2a   : > { %1018 = vmatpush3.bf16.msra.mxu1 %v1017_v39  ;;  %v1026_v47 = vpack.c.bf16 %v405_v46, %v404_v45  ;;  %v1029_v50 = vpack.c.bf16 %v407_v49, %v406_v48  ;;  %v408_v55 = vld [vmem:[%s1440_s10 + $0x50] sm:$0xff]  ;;  %v409_v56 = vld [vmem:[%s1440_s10 + $0x58] sm:$0xff]  ;;  %v410_v58 = vld [vmem:[%s1440_s10 + $0x60] sm:$0xff] }
  0x2b   : > { %vm541_vm4 = vcmp.ne.s32.totalorder %v540_v32, 0  ;;  %1019 = vmatprep.subr.bf16.mxu1 %v1252_v0  ;;  %v1032_v57 = vpack.c.bf16 %v409_v56, %v408_v55  ;;  %v411_v59 = vld [vmem:[%s1440_s10 + $0x68] sm:$0xff]  ;;  %v412_v61 = vld [vmem:[%s1440_s10 + $0x70] sm:$0xff]  ;;  %v413_v62 = vld [vmem:[%s1440_s10 + $0x78] sm:$0xff]  ;;  %s1124_s10 = scalar_lea.vmem %s663_s30, 128 }
  0x2c   : > { %991 = vmatpush3.bf16.xpose.msk.msra.mxu0 %vm1385_vm2, %v989_v8  ;;  %v1035_v60 = vpack.c.bf16 %v411_v59, %v410_v58  ;;  %v1038_v63 = vpack.c.bf16 %v413_v62, %v412_v61  ;;  %p1125_p0 = scmp.ne.s32.totalorder %s663_s30, %s1124_s10  ;;  %p1132_p5 = scmp.lt.s32.totalorder %s1130_s14, %s1124_s10 }
  0x2d   : > { %992 = vmatprep.subr.bf16.mxu0 %v1252_v0 }
  0x2e   : > { %1021 = vmatpush3.bf16.msra.mxu1 %v1020_v41  ;;  %p1126_p1 = pnand %p1125_p0, %p1339_p3  ;;  %p1133_p6 = por %p1132_p5, %p1131_p4 }
  0x2f   : > { %1022 = vmatprep.subr.bf16.mxu1 %v1252_v0 }
  0x30   : > { %p1127_p2 = pneg %p1126_p1 }
  0x32   : > { %1024 = vmatpush3.bf16.msra.mxu1 %v1023_v44  ;;  %p1134_p7 = pnand %p1133_p6, %p1127_p2 }
  0x33   : > { %1025 = vmatprep.subr.bf16.mxu1 %v1252_v0 }
  0x34   : > { %995 = vmatpush3.bf16.xpose.msk.msra.mxu0 %vm1385_vm2, %v993_v11 }
  0x35   : > { %996 = vmatprep.subr.bf16.mxu0 %v1252_v0 }
  0x36   : > { %1027 = vmatpush3.bf16.msra.mxu1 %v1026_v47 }
  0x37   : > { %1028 = vmatprep.subr.bf16.mxu1 %v1252_v0 }
  0x3a   : > { %1030 = vmatpush3.bf16.msra.mxu1 %v1029_v50 }
  0x3b   : > { %1031 = vmatprep.subr.bf16.mxu1 %v1252_v0 }
  0x3c   : > { %999 = vmatpush3.bf16.xpose.msk.msra.mxu0 %vm1385_vm2, %v997_v14 }
  0x3d   : > { %1000 = vmatprep.subr.bf16.mxu0 %v1252_v0 }
  0x3e   : > { %1033 = vmatpush3.bf16.msra.mxu1 %v1032_v57 }
  0x3f   : > { %1034 = vmatprep.subr.bf16.mxu1 %v1252_v0 }
  0x42   : > { %1036 = vmatpush3.bf16.msra.mxu1 %v1035_v60 }
  0x43   : > { %1037 = vmatprep.subr.bf16.mxu1 %v1252_v0 }
  0x44   : > { %1003 = vmatpush3.bf16.xpose.msk.msra.mxu0 %vm1385_vm2, %v1001_v17 }
  0x45   : > { %1004 = vmatprep.subr.bf16.mxu0 %v1252_v0 }
  0x46   : > { %1039 = vmatpush3.bf16.msra.mxu1 %v1038_v63 }
  0x4c   : > { %1007 = vmatpush3.bf16.xpose.msk.msra.mxu0 %vm1385_vm2, %v1005_v20 }
  0x4d   : > { %1008 = vmatprep.subr.bf16.mxu0 %v1252_v0 }
  0x54   : > { %1011 = vmatpush3.bf16.xpose.msk.msra.mxu0 %vm1385_vm2, %v1009_v23 }
  0x55   : > { %1012 = vmatprep.subr.bf16.mxu0 %v1252_v0 }
  0x5c   : > { %1015 = vmatpush3.bf16.xpose.msk.msra.mxu0 %vm1385_vm2, %v1013_v26 }
  0x63   : > { %947 = vmatmul.mubr.msk.f32.vlgmr.msra.gmra.mrb[0].mxu0 %vm415_vm1, %v414_v28 }
 0x136   : > { %v533_v33 = vpop.f32.mrb[0].mxu0 }
 0x137   : > { %v948_v34 = vpop.f32.mrb[1].mxu0  ;;  %v542_v35 = vsel %vm541_vm4, %v533_v33, -1e+09 }
 0x138   : > { %543 = vmax.xlane.f32.xlu0 %v542_v35 }
 0x1c5   : > { %v544_v51 = vpop.xlane.xlu0 %543 }
 0x1c6   : > { %v545_v52 = vsub.f32 %v542_v35, %v544_v51 }
 0x1c8   : > { %v546_v53 = vmul.f32 1.442695, %v545_v52 }
 0x1ca   : > { %1120 = vpow2.f32 %v546_v53 }
 0x1d4   : > { %v1121_v54 = vpop.eup %1120 }
 0x1d5   : > { %548 = vadd.xlane.f32.xlu0 %v1121_v54 }
 0x262   : > { %v549_v1 = vpop.xlane.xlu0 %548 }
 0x263   : > { %1122 = vrcp.f32 %v549_v1 }
 0x26d   : > { %v1123_v2 = vpop.eup %1122 }
 0x26e   : > { %v551_v3 = vmul.f32 %v1123_v2, %v1121_v54 }
 0x270   : > { %982 = vmatmul.mubr.f32.vlgmr.msra.gmra.mrb[0].mxu1 %v551_v3  ;;  %623 = vst [vmem:[%s342_s8] sm:$0xff] %v551_v3 }
 0x271   : > { %1137 = shalt.err (!%p1134_p7)
}
 0x272   : > { %s1138_s8 = scalar_lea.hbm %s1481_s27, 128  ;;  %s1142_s22 = scalar_lea.hbm %s1568_s5, 512 }
 0x273   : > { %p1139_p9 = scmp.ne.s32.totalorder %s1481_s27, %s1138_s8  ;;  %p1143_p12 = scmp.lt.u32.totalorder %s1481_s27, %s1568_s5 }
 0x274   : > { %p1144_p13 = scmp.lt.u32.totalorder %s1142_s22, %s1138_s8  ;;  %p1146_p1 = scmp.lt.u32.totalorder %s1138_s8, %s1481_s27 }
 0x275   : > { %p1140_p10 = pnand %p1139_p9, %p1339_p3 }
 0x276   : > { %p1145_p0 = por %p1144_p13, %p1143_p12 }
 0x277   : > { %p1141_p11 = pneg %p1140_p10 }
 0x278   : > { %p1147_p2 = por %p1146_p1, %p1145_p0 }
 0x27a   : > { %p1148_p4 = pnand %p1147_p2, %p1141_p11 }
 0x27c   : > { %1151 = shalt.err (!%p1148_p4)
}
 0x27d   : > { %1041 = dma.vmem_to_hbm [thread:$0]  (%p1339_p3), %s663_s30, 128, %s1481_s27, %s630_s9  }
 0x27e   : > { %s335_s10 = scalar_lea.vmem [#allocation2], %s844_s17  ;;  %s1574_s12 = sshll.u32 %s1473_s15, 7 }
 0x27f   : > { %s646_s14 = sshll.u32 %s335_s10, 4  ;;  %s1508_s22 = scalar_lea.hbm %s1567_s4, %s1574_s12  ;;  %s1510_s14 = int_to_ptr.vmem [resolvable:$true] %s646_s14 }
 0x280   : > { %s625_s8 = scalar_lea.sflag [#allocation3], %s1466_s16  ;;  %s1152_s27 = scalar_lea.vmem %s1510_s14, 128 }
 0x281   : > { %p1153_p5 = scmp.ne.s32.totalorder %s1510_s14, %s1152_s27  ;;  %s1257_s17 = smov [#allocation2]  }
 0x282   : > { %s1156_s15 = sshll.u32 %s1257_s17, 4  ;;  %s1157_s15 = int_to_ptr.vmem [resolvable:$false] %s1156_s15 }
 0x283   : > { %p1154_p6 = pnand %p1153_p5, %p1339_p3  ;;  %s1158_s30 = scalar_lea.vmem %s1157_s15, 256 }
 0x284   : > { %p1159_p9 = scmp.lt.s32.totalorder %s1510_s14, %s1157_s15  ;;  %p1160_p10 = scmp.lt.s32.totalorder %s1158_s30, %s1152_s27 }
 0x285   : > { %p1155_p7 = pneg %p1154_p6 }
 0x286   : > { %p1161_p11 = por %p1160_p10, %p1159_p9 }
 0x288   : > { %p1162_p12 = pnand %p1161_p11, %p1155_p7 }
 0x343   : > { %v618_v0 = vpop.f32.mrb[0].mxu1 }
 0x344   : > { %622 = vst.msk [vmem:[%s335_s10] sm:$0xff] %vm415_vm1, %v618_v0  ;;  %v983_v4 = vpop.f32.mrb[1].mxu1 }
 0x345   : > { %1165 = shalt.err (!%p1162_p12)
}
 0x346   : > { %s1166_s16 = scalar_lea.hbm %s1508_s22, 128  ;;  %s1170_s10 = scalar_lea.hbm %s1567_s4, 512 }
 0x347   : > { %p1167_p13 = scmp.ne.s32.totalorder %s1508_s22, %s1166_s16  ;;  %p1171_p2 = scmp.lt.u32.totalorder %s1508_s22, %s1567_s4 }
 0x348   : > { %p1172_p4 = scmp.lt.u32.totalorder %s1170_s10, %s1166_s16  ;;  %p1174_p6 = scmp.lt.u32.totalorder %s1166_s16, %s1508_s22 }
 0x349   : > { %p1168_p0 = pnand %p1167_p13, %p1339_p3 }
 0x34a   : > { %p1173_p5 = por %p1172_p4, %p1171_p2 }
 0x34b   : > { %p1169_p1 = pneg %p1168_p0 }
 0x34c   : > { %p1175_p7 = por %p1174_p6, %p1173_p5 }
 0x34e   : > { %p1176_p9 = pnand %p1175_p7, %p1169_p1 }
 0x350   : > { %1179 = shalt.err (!%p1176_p9)
}
 0x351   : > { %1040 = dma.vmem_to_hbm [thread:$0]  (%p1339_p3), %s1510_s14, 128, %s1508_s22, %s625_s8  }
 0x352 PF: > { %p1051_p10 = scmp.ge.s32.totalorder %s1250_s25, 2  ;;  %s674_s13 = sand.u32 1, %s1222_s18  }
 0x353   : > { %s675_s27 = scalar_lea.sflag [#allocation3], %s674_s13 }
 0x354   : > { %p1045_p11 = pnand %p1051_p10, %p1348_p8 }
 0x356   : > { %1213 = dma.done.wait (!%p1045_p11), %s675_s27, 128  }
 0x357   : > { %1215 = vsyncadd (!%p1045_p11), %s675_s27, 4294967168  ;;  %s684_s17 = scalar_lea.sflag [#allocation5], %s674_s13 }
 0x358   : > { %1217 = dma.done.wait (!%p1045_p11), %s684_s17, 128  }
 0x359   : > { %1219 = vsyncadd (!%p1045_p11), %s684_s17, 4294967168  ;;  %s22_s25 = sadd.s32 1, %s1250_s25   ;;  %s1575_s18 = smov %s1226_s19 }
 0x35a   : > { %p19_p12 = scmp.ge.s32.totalorder %s22_s25, 6   ;;  %s1576_s19 = smov %s1230_s20 }
 0x35b   : > { %s1577_s20 = smov %s1357_s11  ;;  %s1578_s21 = smov %s1242_s23 }
 0x35c   : > { %s1579_s22 = smov %s1246_s24  ;;  %s1580_s23 = smov %s1583_s28 }
 0x35d   : > { %s1581_s24 = smov %s1587_s29  ;;  %21 = sbr.rel (!%p19_p12) target bundleno = 7 (0x7), region = 97 }
 0x364   :  { %689 = vsyncpa [#allocation3], 1 }
 0x365   :  { %691 = vsyncpa [#allocation3 + $0x1], 1 }
 0x366   :  { %692 = vsyncpa [#allocation5], 1 }
 0x367   :  { %694 = vsyncpa [#allocation5 + $0x1], 1 }

</bundles_post_ra>
